<compile_context>
chip_gen: v7x
topology: tpu7x:2x2x1
jax: 0.10.0
libtpu: 0.0.40
codegen_flags: <defaults>
</compile_context>

<pallas_src>
import jax
import jax.numpy as jnp
from jax.experimental import pallas as pl
from jax.experimental.pallas import tpu as pltpu

_EPS = 1e-8


def _make_fc_l2norm_kernel(apply_l2norm: bool):
    """fc (x @ W_t + b) with optional row-wise l2norm epilogue."""

    def kernel(x_ref, w_ref, b_ref, o_ref):
        # x_ref: [TM, K] bf16   w_ref: [K, E] bf16 (resident)   b_ref: [1, E] f32
        acc = jnp.dot(x_ref[...], w_ref[...],
                      preferred_element_type=jnp.float32)      # MXU, f32 acc
        feats = acc + b_ref[...]                                # f32 epilogue
        if apply_l2norm:
            ssq = jnp.sum(feats * feats, axis=-1, keepdims=True)
            norm = jnp.sqrt(ssq) + _EPS                         # eps AFTER sqrt
            feats = feats * pl.reciprocal(norm, approx=True)    # EUP, ~free
        o_ref[...] = feats.astype(o_ref.dtype)

    return kernel


def _make_mean_l2norm_kernel(apply_l2norm: bool, n_regions: int):
    """Mean over the region axis with optional l2norm of the mean."""
    inv_r = 1.0 / float(n_regions)

    def kernel(f_ref, o_ref):
        f = f_ref[...]                              # [TB, R, E] f32
        m = jnp.sum(f, axis=1) * inv_r              # [TB, E]
        if apply_l2norm:
            ssq = jnp.sum(m * m, axis=-1, keepdims=True)
            norm = jnp.sqrt(ssq) + _EPS
            m = m * pl.reciprocal(norm, approx=True)
        o_ref[...] = m.astype(o_ref.dtype)

    return kernel


def encoder_image_precomp(images, w_t, b, *, no_imgnorm=False,
                          block_rows=256, block_batch=32):
    """Forward pass of EncoderImagePrecomp.

    images: [batch, n_regions, img_dim] (any float dtype; matmul runs in bf16).
    w_t   : [img_dim, embed]  fc weight, stored pre-transposed (one-time prep).
    b     : [embed]           fc bias.
    Returns (features [batch, n_regions, embed] f32, features_mean [batch, embed] f32).
    """
    assert images.ndim == 3, "expected [batch, n_regions, img_dim]"
    batch, n_regions, img_dim = images.shape
    k_dim, embed = w_t.shape
    assert k_dim == img_dim

    n = batch * n_regions

    # bf16 MXU inputs (no-op casts if the caller already stores bf16), f32 bias.
    x2d = images.reshape(n, img_dim).astype(jnp.bfloat16)
    w_bf = w_t.astype(jnp.bfloat16)
    b2d = b.reshape(1, embed).astype(jnp.float32)

    # ------------- Kernel 1: row-tiled fc (+ per-row l2norm) -------------
    tm = n if n <= block_rows else block_rows        # block_rows % 16 == 0
    n_blocks = -(-n // tm)
    n_pad = n_blocks * tm
    if n_pad != n:                                   # pad rows; sliced off below
        x2d = jnp.pad(x2d, ((0, n_pad - n), (0, 0)))

    features = pl.pallas_call(
        _make_fc_l2norm_kernel(not no_imgnorm),
        out_shape=jax.ShapeDtypeStruct((n_pad, embed), jnp.float32),
        grid=(n_blocks,),
        in_specs=[
            pl.BlockSpec((tm, img_dim), lambda i: (i, 0)),
            pl.BlockSpec((img_dim, embed), lambda i: (0, 0)),   # resident weight
            pl.BlockSpec((1, embed), lambda i: (0, 0)),         # resident bias
        ],
        out_specs=pl.BlockSpec((tm, embed), lambda i: (i, 0)),
        compiler_params=pltpu.CompilerParams(
            dimension_semantics=("parallel",),
            vmem_limit_bytes=48 * 1024 * 1024,
        ),
    )(x2d, w_bf, b2d)

    features = features[:n].reshape(batch, n_regions, embed)

    # ------------- Kernel 2: mean over regions (+ l2norm) -------------
    tb = batch if batch <= block_batch else block_batch   # block_batch % 8 == 0
    b_blocks = -(-batch // tb)
    batch_pad = b_blocks * tb
    feats_in = features
    if batch_pad != batch:
        feats_in = jnp.pad(features, ((0, batch_pad - batch), (0, 0), (0, 0)))

    features_mean = pl.pallas_call(
        _make_mean_l2norm_kernel(not no_imgnorm, n_regions),
        out_shape=jax.ShapeDtypeStruct((batch_pad, embed), jnp.float32),
        grid=(b_blocks,),
        in_specs=[pl.BlockSpec((tb, n_regions, embed), lambda i: (i, 0, 0))],
        out_specs=pl.BlockSpec((tb, embed), lambda i: (i, 0)),
        compiler_params=pltpu.CompilerParams(
            dimension_semantics=("parallel",),
        ),
    )(feats_in)

    features_mean = features_mean[:batch]
    return features, features_mean


if __name__ == "__main__":
    # Small shapes consistent with the module: precomputed region features.
    batch, n_regions, img_dim, embed_size = 2, 8, 32, 32

    key = jax.random.PRNGKey(0)
    k_x, k_w, k_b = jax.random.split(key, 3)

    # Xavier-uniform init of fc as in init_weights() (init zeroes the bias; we
    # use a small random bias here purely to exercise the bias-add path).
    r = jnp.sqrt(6.0) / jnp.sqrt(jnp.float32(img_dim + embed_size))
    w = jax.random.uniform(k_w, (embed_size, img_dim), jnp.float32, -r, r)
    b = jax.random.uniform(k_b, (embed_size,), jnp.float32, -r, r)
    images = jax.random.normal(k_x, (batch, n_regions, img_dim), jnp.float32)

    # One-time parameter prep: store the weight pre-transposed for the kernel.
    w_t = jnp.transpose(w)    # [img_dim, embed]

    feats, feats_mean = encoder_image_precomp(images, w_t, b, no_imgnorm=False)
    feats, feats_mean = jax.block_until_ready((feats, feats_mean))

    # Pure-JAX reference (matmul inputs rounded to bf16 like the kernel; the
    # remaining delta is f32 accumulation order + the EUP approx reciprocal).
    xb = images.astype(jnp.bfloat16).astype(jnp.float32)
    wb = w.astype(jnp.bfloat16).astype(jnp.float32)
    ref = jnp.einsum("brk,ek->bre", xb, wb) + b
    ref = ref / (jnp.sqrt(jnp.sum(ref * ref, axis=-1, keepdims=True)) + 1e-8)
    ref_mean = jnp.mean(ref, axis=1)
    ref_mean = ref_mean / (
        jnp.sqrt(jnp.sum(ref_mean * ref_mean, axis=-1, keepdims=True)) + 1e-8)

    assert feats.shape == (batch, n_regions, embed_size)
    assert feats_mean.shape == (batch, embed_size)
    assert jnp.allclose(feats, ref, atol=1e-2, rtol=1e-2)
    assert jnp.allclose(feats_mean, ref_mean, atol=1e-2, rtol=1e-2)

    print("KERNEL_OK")
</pallas_src>

<mosaic_0001>
module attributes {stable_mosaic.version = 11 : i64} {
  func.func @kernel(%arg0: i32, %arg1: memref<16x32xbf16, #tpu.memory_space<vmem>>, %arg2: memref<32x32xbf16, #tpu.memory_space<vmem>>, %arg3: memref<1x32xf32, #tpu.memory_space<vmem>>, %arg4: memref<16x32xf32, #tpu.memory_space<vmem>>) attributes {dimension_semantics = [#tpu.dimension_semantics<parallel>], iteration_bounds = array<i64: 1>, scalar_prefetch = 0 : i64, scratch_operands = 0 : i64, tpu.core_type = #tpu.core_type<tc>, window_params = [{transform_indices = @transform_0, window_bounds = array<i64: 16, 32>}, {pipeline_mode = #tpu.pipeline_mode<synchronous>, transform_indices = @transform_1, window_bounds = array<i64: 32, 32>}, {pipeline_mode = #tpu.pipeline_mode<synchronous>, transform_indices = @transform_2, window_bounds = array<i64: 1, 32>}, {transform_indices = @transform_3, window_bounds = array<i64: 16, 32>}]} {
    %c0 = arith.constant 0 : index
    %c0_0 = arith.constant 0 : index
    %0 = vector.load %arg1[%c0, %c0_0] : memref<16x32xbf16, #tpu.memory_space<vmem>>, vector<16x32xbf16>
    %c0_1 = arith.constant 0 : index
    %c0_2 = arith.constant 0 : index
    %1 = vector.load %arg2[%c0_1, %c0_2] : memref<32x32xbf16, #tpu.memory_space<vmem>>, vector<32x32xbf16>
    %cst = arith.constant dense<0.000000e+00> : vector<16x32xf32>
    %2 = tpu.matmul %0, %1, %cst {dimension_numbers = #tpu.dot_dimension_numbers<[1], [0], [0], [1], [0, 0, 1, 1], [], []>} : vector<16x32xbf16>, vector<32x32xbf16>, vector<16x32xf32> -> vector<16x32xf32>
    %c0_3 = arith.constant 0 : index
    %c0_4 = arith.constant 0 : index
    %3 = vector.load %arg3[%c0_3, %c0_4] : memref<1x32xf32, #tpu.memory_space<vmem>>, vector<1x32xf32>
    %4 = vector.broadcast %3 : vector<1x32xf32> to vector<16x32xf32>
    %5 = arith.addf %2, %4 : vector<16x32xf32>
    %6 = arith.mulf %5, %5 : vector<16x32xf32>
    %cst_5 = arith.constant dense<0.000000e+00> : vector<16xf32>
    %7 = vector.multi_reduction <add>, %6, %cst_5 [1] : vector<16x32xf32> to vector<16xf32>
    %8 = vector.shape_cast %7 : vector<16xf32> to vector<16x1xf32>
    %9 = math.sqrt %8 : vector<16x1xf32>
    %cst_6 = arith.constant 9.99999993E-9 : f32
    %10 = vector.broadcast %cst_6 : f32 to vector<16x1xf32>
    %11 = arith.addf %9, %10 : vector<16x1xf32>
    %12 = tpu.reciprocal %11 {approx = true} : vector<16x1xf32> -> vector<16x1xf32>
    %13 = vector.broadcast %12 : vector<16x1xf32> to vector<16x32xf32>
    %14 = arith.mulf %5, %13 : vector<16x32xf32>
    %c0_7 = arith.constant 0 : index
    %c0_8 = arith.constant 0 : index
    %15 = vector.load %arg4[%c0_7, %c0_8] : memref<16x32xf32, #tpu.memory_space<vmem>>, vector<16x32xf32>
    tpu.vector_store %arg4[%c0_7, %c0_8], %14 {strides = array<i32>} : memref<16x32xf32, #tpu.memory_space<vmem>>, vector<16x32xf32>,
    return
  }
  func.func @transform_0(%arg0: i32) -> (i32, i32) {
    %c0_i32 = arith.constant 0 : i32
    %c0_i32_0 = arith.constant 0 : i32
    return %arg0, %c0_i32 : i32, i32
  }
  func.func @transform_1(%arg0: i32) -> (i32, i32) {
    %c0_i32 = arith.constant 0 : i32
    %c0_i32_0 = arith.constant 0 : i32
    %c0_i32_1 = arith.constant 0 : i32
    return %c0_i32, %c0_i32_0 : i32, i32
  }
  func.func @transform_2(%arg0: i32) -> (i32, i32) {
    %c0_i32 = arith.constant 0 : i32
    %c0_i32_0 = arith.constant 0 : i32
    %c0_i32_1 = arith.constant 0 : i32
    return %c0_i32, %c0_i32_0 : i32, i32
  }
  func.func @transform_3(%arg0: i32) -> (i32, i32) {
    %c0_i32 = arith.constant 0 : i32
    %c0_i32_0 = arith.constant 0 : i32
    return %arg0, %c0_i32 : i32, i32
  }
}

</mosaic_0001>

<bundles_post_ra>
// kernel: tpu_custom_call.1
= control target key start
LH: loop header
LB: loop body
LE: loop exit
PB: predicated region body
PF: predicated region fallthrough
CT: control target
= control target key end

     0   :  { %8 = vsyncpa [#allocation3], 0  ;;  %s348_s0 = inlined_call_operand.hbm [shape: bf16[16,32], index: 0, kind: input, shape index: {}]   ;;  %s349_s1 = inlined_call_operand.hbm [shape: bf16[32,32], index: 1, kind: input, shape index: {}]   ;;  %s350_s2 = inlined_call_operand.vmem [shape: f32[1,32], index: 2, kind: input, shape index: {}]   ;;  %s351_s3 = inlined_call_operand.hbm [shape: f32[16,32], index: 3, kind: output, shape index: {}]  }
   0x1   :  { %9 = vsyncpa [#allocation6], 0 }
   0x2   :  { %10 = vsyncpa [#allocation4], 0  ;;  %s275_s12 = smov [#allocation2]   ;;  %s203_s16 = scalar_lea.hbm %s348_s0, 128 }
   0x3   :  { %s16_s13 = sshll.u32 %s275_s12, 4  ;;  %p204_p0 = scmp.ne.s32.totalorder %s348_s0, %s203_s16  ;;  %s17_s13 = int_to_ptr.vmem [resolvable:$true] %s16_s13 }
   0x4   :  { %p207_p1 = scmp.lt.u32.totalorder %s203_s16, %s348_s0 }
   0x6   :  { %p209_p2 = pnand %p207_p1, %p204_p0 }
   0x8   :  { %212 = shalt.err (!%p209_p2)
}
   0x9   :  { %s213_s21 = scalar_lea.vmem %s17_s13, 128  ;;  %p218_p4 = scmp.lt.s32.totalorder %s17_s13, %s17_s13 }
   0xa   :  { %p214_p3 = scmp.ne.s32.totalorder %s17_s13, %s213_s21  ;;  %p219_p5 = scmp.lt.s32.totalorder %s213_s21, %s213_s21 }
   0xc   :  { %p220_p6 = por %p219_p5, %p218_p4 }
   0xe   :  { %p221_p7 = pnand %p220_p6, %p214_p3 }
  0x10   :  { %224 = shalt.err (!%p221_p7)
}
  0x11   :  { %s276_s22 = smov 64   ;;  %s277_s23 = smov 4  }
  0x12   :  { %22 = dma.hbm_to_vmem [thread:$0]  %s348_s0, 128, %s17_s13, [#allocation3], %s276_s22, %s276_s22, %s277_s23  }
  0x13   :  { %s278_s26 = smov [#allocation5]   ;;  %s225_s30 = scalar_lea.hbm %s349_s1, 256 }
  0x14   :  { %s28_s27 = sshll.u32 %s278_s26, 4  ;;  %p226_p8 = scmp.ne.s32.totalorder %s349_s1, %s225_s30  ;;  %s29_s27 = int_to_ptr.vmem [resolvable:$true] %s28_s27 }
  0x15   :  { %p229_p9 = scmp.lt.u32.totalorder %s225_s30, %s349_s1 }
  0x17   :  { %p231_p10 = pnand %p229_p9, %p226_p8 }
  0x19   :  { %234 = shalt.err (!%p231_p10)
}
  0x1a   :  { %s235_s8 = scalar_lea.vmem %s29_s27, 256  ;;  %p240_p12 = scmp.lt.s32.totalorder %s29_s27, %s29_s27 }
  0x1b   :  { %p236_p11 = scmp.ne.s32.totalorder %s29_s27, %s235_s8  ;;  %p241_p13 = scmp.lt.s32.totalorder %s235_s8, %s235_s8 }
  0x1d   :  { %p242_p0 = por %p241_p13, %p240_p12 }
  0x1f   :  { %p243_p1 = pnand %p242_p0, %p236_p11 }
  0x21   :  { %246 = shalt.err (!%p243_p1)
}
  0x22   :  { %34 = dma.hbm_to_vmem [thread:$0]  %s349_s1, 256, %s29_s27, [#allocation6], %s276_s22, %s276_s22, %s277_s23  }
  0x23   :  { %269 = dma.done.wait [#allocation3], 128  }
  0x24   :  { %270 = vsyncadd [#allocation3], 4294967168 }
  0x25   :  { %271 = dma.done.wait [#allocation6], 256  }
  0x26   :  { %272 = vsyncadd [#allocation6], 4294967040  ;;  %v279_v0 = vmov 0.0   ;;  %vm280_vm0 = vmmov 0   ;;  %v192_v1 = vld [vmem:[#allocation5] sm:$0xff]   ;;  %v193_v2 = vld [vmem:[#allocation5 + $0x8] sm:$0xff]  }
  0x27   :  { %175 = vmatprep.subr.bf16.mxu0 %v279_v0  ;;  %179 = vmatprep.mubr.msk.bf16.mxu0 %vm280_vm0, %v279_v0  ;;  %v194_v3 = vld [vmem:[#allocation2] sm:$0xff]   ;;  %vm74_vm1 = vcmask 261120   ;;  %s281_s1 = smov [#allocation7]  }
  0x28   :  { %176 = vmatpush3.bf16.msra.mxu0 %v192_v1  ;;  %v167_v4 = vld [vmem:[%s350_s2] ss:$0 sm:$0xff]  ;;  %s154_s2 = sshll.u32 %s281_s1, 4  ;;  %s155_s2 = int_to_ptr.vmem [resolvable:$true] %s154_s2 }
  0x29   :  { %177 = vmatprep.subr.bf16.mxu0 %v279_v0  ;;  %s247_s12 = scalar_lea.vmem %s155_s2, 256  ;;  %p252_p3 = scmp.lt.s32.totalorder %s155_s2, %s155_s2 }
  0x2a   :  { %p248_p2 = scmp.ne.s32.totalorder %s155_s2, %s247_s12  ;;  %p253_p4 = scmp.lt.s32.totalorder %s247_s12, %s247_s12 }
  0x2c   :  { %178 = vmatpush3.bf16.msra.mxu0 %v193_v2  ;;  %p254_p5 = por %p253_p4, %p252_p3 }
  0x2e   :  { %p255_p6 = pnand %p254_p5, %p248_p2 }
  0x2f   :  { %180 = vmatmul.mubr.msk.bf16.vlgmr.msra.gmra.mrb[0].mxu0 %vm74_vm1, %v194_v3 }
 0x102   :  { %v112_v5 = vpop.f32.mrb[0].mxu0 }
 0x103   :  { %v113_v6 = vadd.f32 %v167_v4, %v112_v5  ;;  %v181_v7 = vpop.f32.mrb[1].mxu0 }
 0x104   :  { %v115_v8 = vpop.f32.mrb[2].mxu0 }
 0x105   :  { %v116_v9 = vadd.f32 %v167_v4, %v115_v8  ;;  %v182_v10 = vpop.f32.mrb[3].mxu0  ;;  %v119_v11 = vmul.f32 %v113_v6, %v113_v6 }
 0x107   :  { %v121_v12 = vsel %vm74_vm1, %v119_v11, 0.0  ;;  %v120_v13 = vmul.f32 %v116_v9, %v116_v9 }
 0x108   :  { %122 = vadd.xlane.f32.xlu0 %v121_v12 }
 0x109   :  { %v124_v14 = vsel %vm74_vm1, %v120_v13, 0.0 }
 0x10c   :  { %125 = vadd.xlane.f32.xlu0 %v124_v14 }
 0x195   :  { %v123_v15 = vpop.xlane.xlu0 %122 }
 0x196   :  { %195 = vrsqrt.f32 %v123_v15  ;;  %vm129_vm2 = vcmp.eq.f32.partialorder %v123_v15, inf  ;;  %v132_v19 = vand.u32 2147483648, %v123_v15  ;;  %vm131_vm3 = vcmp.eq.f32.partialorder %v123_v15, 0.0 }
 0x199   :  { %v126_v16 = vpop.xlane.xlu0 %125 }
 0x19a   :  { %197 = vrsqrt.f32 %v126_v16  ;;  %vm136_vm4 = vcmp.eq.f32.partialorder %v126_v16, inf  ;;  %v139_v25 = vand.u32 2147483648, %v126_v16  ;;  %vm138_vm5 = vcmp.eq.f32.partialorder %v126_v16, 0.0 }
 0x1a0   :  { %v196_v17 = vpop.eup %195 }
 0x1a1   :  { %v128_v18 = vmul.f32 %v196_v17, %v123_v15 }
 0x1a3   :  { %v130_v20 = vsel %vm129_vm2, %v123_v15, %v128_v18 }
 0x1a4   :  { %v198_v21 = vpop.eup %197  ;;  %v133_v22 = vsel %vm131_vm3, %v132_v19, %v130_v20 }
 0x1a5   :  { %v141_v23 = vadd.f32 1e-08, %v133_v22  ;;  %v135_v24 = vmul.f32 %v198_v21, %v126_v16 }
 0x1a7   :  { %199 = vrcp.f32 %v141_v23  ;;  %v137_v26 = vsel %vm136_vm4, %v126_v16, %v135_v24 }
 0x1a8   :  { %v140_v27 = vsel %vm138_vm5, %v139_v25, %v137_v26 }
 0x1a9   :  { %v142_v28 = vadd.f32 1e-08, %v140_v27 }
 0x1ab   :  { %201 = vrcp.f32 %v142_v28 }
 0x1b1   :  { %v200_v29 = vpop.eup %199 }
 0x1b2   :  { %v145_v30 = vmul.f32 %v200_v29, %v113_v6 }
 0x1b4   :  { %147 = vst.msk [vmem:[#allocation7] sm:$0xff] %vm74_vm1, %v145_v30 }
 0x1b5   :  { %v202_v31 = vpop.eup %201 }
 0x1b6   :  { %v146_v32 = vmul.f32 %v202_v31, %v116_v9 }
 0x1b8   :  { %148 = vst.msk [vmem:[#allocation7 + $0x8] sm:$0xff] %vm74_vm1, %v146_v32 }
 0x1b9   :  { %258 = shalt.err (!%p255_p6)
}
 0x1ba   :  { %s259_s15 = scalar_lea.hbm %s351_s3, 256 }
 0x1bb   :  { %p260_p7 = scmp.ne.s32.totalorder %s351_s3, %s259_s15  ;;  %p263_p8 = scmp.lt.u32.totalorder %s259_s15, %s351_s3 }
 0x1bd   :  { %p265_p9 = pnand %p263_p8, %p260_p7 }
 0x1bf   :  { %268 = shalt.err (!%p265_p9)
}
 0x1c0   :  { %s282_s20 = smov 128   ;;  %s283_s21 = smov 8  }
 0x1c1   :  { %160 = dma.vmem_to_hbm [thread:$0]  %s155_s2, 256, %s351_s3, [#allocation4], %s282_s20, %s282_s20, %s283_s21  }
 0x1c2   :  { %273 = dma.done.wait [#allocation4], 256  }
 0x1c3   :  { %274 = vsyncadd [#allocation4], 4294967040 }
 0x1c4   :  { %164 = vsyncpa [#allocation3], 1 }
 0x1c5   :  { %165 = vsyncpa [#allocation6], 1 }
 0x1c6   :  { %166 = vsyncpa [#allocation4], 1 }

</bundles_post_ra>
